<compile_context>
chip_gen: v7x
topology: tpu7x:2x2x1
jax: 0.10.0
libtpu: 0.0.40
codegen_flags: <defaults>
</compile_context>

<pallas_src>
import functools

import jax
import jax.numpy as jnp
from jax import lax
from jax.experimental import pallas as pl
from jax.experimental.pallas import tpu as pltpu

_EPS = 1e-8  # matches torch: x / (x.norm(dim=1, keepdim=True) + 1e-8)


def _l2_normalize(v):
    # One sqrt + one reciprocal per row, then a single VPU multiply per element.
    norm = jnp.sqrt(jnp.sum(v * v, axis=1, keepdims=True))
    return v * pl.reciprocal(norm + _EPS, approx=False)


def _contrastive_loss_kernel(x_ref, y_ref, out_ref, *, tq):
    f32 = jnp.float32
    B = x_ref.shape[0]

    # In-kernel cast: inputs may arrive as bf16 (wrapper does NOT pre-cast).
    x = x_ref[...].astype(f32)
    y = y_ref[...].astype(f32)

    # Full key set, L2-normalized (input blocks are resident across the grid).
    x_keys = _l2_normalize(x)            # (B, F)
    y_keys = _l2_normalize(y)            # (B, F)

    # Row tile of queries for this grid step (same rows taken from x and y).
    if tq == B:
        xq, yq = x_keys, y_keys
    else:
        r0 = pl.multiple_of(pl.program_id(0) * tq, tq)
        xq = _l2_normalize(x_ref[pl.ds(r0, tq), :].astype(f32))   # (tq, F)
        yq = _l2_normalize(y_ref[pl.ds(r0, tq), :].astype(f32))   # (tq, F)

    # One fused MXU contraction: [xq; yq] @ [x_keys; y_keys].T -> (2*tq, 2*B).
    q = jnp.concatenate([xq, yq], axis=0)            # (2*tq, F)
    k = jnp.concatenate([x_keys, y_keys], axis=0)    # (2*B, F)
    corr = lax.dot_general(
        q, k,
        dimension_numbers=(((1,), (1,)), ((), ())),
        preferred_element_type=f32,
    )                                                # (2*tq, 2*B)

    # log(positive/total) == corr_ii - log(rowsum(exp(corr))): no identity mask,
    # no masked reduce, no divide.  Rows are unit-norm so corr in [-1, 1] and
    # exp() cannot overflow (no max-shift needed).
    # Needed blocks: xx = corr[:tq, :B], xy = corr[:tq, B:], yy = corr[tq:, B:]
    # (the yx quadrant is produced by the fused matmul but never exp'd).
    s_xx = jnp.sum(jnp.exp(corr[:tq, :B]), axis=1, keepdims=True)     # (tq, 1)
    s_xy_yy = jnp.sum(jnp.exp(corr[:, B:]), axis=1, keepdims=True)    # (2*tq, 1)
    lse_sum = jnp.sum(jnp.log(s_xx)) + jnp.sum(jnp.log(s_xy_yy))

    # Diagonal ("positive") terms straight from the normalized row tiles:
    # trace(xx) + trace(xy) + trace(yy), restricted to this tile's rows.
    trace = jnp.sum(xq * (xq + yq) + yq * yq)

    # Per-row-tile partial loss (scalar to SMEM); wrapper sums over tiles.
    out_ref[0, 0] = lse_sum - trace


def _choose_row_tile(batch, max_tile):
    """Largest row tile <= max_tile that divides batch and is a multiple of 8."""
    if batch <= max_tile:
        return batch
    for t in range(max_tile - (max_tile % 8), 7, -8):
        if batch % t == 0:
            return t
    return batch  # fall back: single tile


def contrastive_loss(x, y, *, max_row_tile=256):
    """x, y: (batch, features) -> scalar float32 loss (matches the torch module)."""
    assert x.ndim == 2 and x.shape == y.shape
    B, F = x.shape
    tq = _choose_row_tile(B, max_row_tile)
    nq = B // tq

    kernel = functools.partial(_contrastive_loss_kernel, tq=tq)

    # Rough VMEM budget: resident inputs, f32/normalized copies, corr + exp tiles.
    itemsize = jnp.dtype(x.dtype).itemsize
    est = (2 * B * F * itemsize            # resident input blocks
           + 4 * B * F * 4                 # f32 casts + normalized keys
           + 4 * tq * F * 4                # normalized query tiles
           + 3 * (2 * tq) * (2 * B) * 4)   # corr + exp temporaries
    vmem_limit = int(min(max(2 * est, 32 * 2**20), 48 * 2**20))

    cost = pl.CostEstimate(
        flops=2 * (2 * B) * (2 * B) * F,        # fused q @ k.T across all row tiles
        transcendentals=3 * B * B + 6 * B,      # exp of xx/xy/yy + sqrt/recip/log
        bytes_accessed=2 * B * F * itemsize + nq * 4,
    )

    partial = pl.pallas_call(
        kernel,
        grid=(nq,),
        out_shape=jax.ShapeDtypeStruct((nq, 1), jnp.float32),
        in_specs=[
            pl.BlockSpec((B, F), lambda i: (0, 0)),   # x: resident keys, one DMA
            pl.BlockSpec((B, F), lambda i: (0, 0)),   # y: resident keys, one DMA
        ],
        out_specs=pl.BlockSpec((1, 1), lambda i: (i, 0),
                               memory_space=pltpu.MemorySpace.SMEM),
        compiler_params=pltpu.CompilerParams(
            dimension_semantics=("parallel",),        # row tiles split across cores
            vmem_limit_bytes=vmem_limit,
        ),
        cost_estimate=cost,
    )(x, y)
    return jnp.sum(partial)


def _reference_loss(x, y):
    # Pure-JAX reference mirroring the PyTorch module exactly.
    def compute_loss(a, b_t):
        corr = jnp.exp(a @ b_t)
        positive = jnp.diag(corr)
        total = jnp.sum(corr, axis=1)
        return -jnp.sum(jnp.log(positive / total))

    xn = x / (jnp.linalg.norm(x, axis=1, keepdims=True) + 1e-8)
    yn = y / (jnp.linalg.norm(y, axis=1, keepdims=True) + 1e-8)
    return compute_loss(xn, xn.T) + compute_loss(xn, yn.T) + compute_loss(yn, yn.T)


if __name__ == "__main__":
    key = jax.random.PRNGKey(0)
    kx, ky = jax.random.split(key)

    # Small shapes consistent with the module: (batch, in_features).
    B, F = 8, 32
    x = jax.random.normal(kx, (B, F), dtype=jnp.float32)
    y = jax.random.normal(ky, (B, F), dtype=jnp.float32)

    loss = jax.block_until_ready(contrastive_loss(x, y))
    ref = jax.block_until_ready(_reference_loss(x, y))
    assert jnp.allclose(loss, ref, rtol=1e-5, atol=1e-5), (loss, ref)

    # Also exercise the row-tiled grid path (4 row tiles of 8 rows each).
    B2, F2 = 32, 32
    x2 = jax.random.normal(kx, (B2, F2), dtype=jnp.float32)
    y2 = jax.random.normal(ky, (B2, F2), dtype=jnp.float32)
    loss2 = jax.block_until_ready(contrastive_loss(x2, y2, max_row_tile=8))
    ref2 = jax.block_until_ready(_reference_loss(x2, y2))
    assert jnp.allclose(loss2, ref2, rtol=1e-5, atol=1e-5), (loss2, ref2)

    print("KERNEL_OK")
</pallas_src>

<mosaic_0001>
module attributes {stable_mosaic.version = 11 : i64} {
  func.func @_contrastive_loss_kernel(%arg0: i32, %arg1: memref<8x32xf32, #tpu.memory_space<vmem>>, %arg2: memref<8x32xf32, #tpu.memory_space<vmem>>, %arg3: memref<1x1xf32, #tpu.memory_space<smem>>) attributes {dimension_semantics = [#tpu.dimension_semantics<parallel>], iteration_bounds = array<i64: 1>, scalar_prefetch = 0 : i64, scratch_operands = 0 : i64, tpu.core_type = #tpu.core_type<tc>, window_params = [{pipeline_mode = #tpu.pipeline_mode<synchronous>, transform_indices = @transform_0, window_bounds = array<i64: 8, 32>}, {pipeline_mode = #tpu.pipeline_mode<synchronous>, transform_indices = @transform_1, window_bounds = array<i64: 8, 32>}, {transform_indices = @transform_2, window_bounds = array<i64: 1, 1>}]} {
    %c0 = arith.constant 0 : index
    %c0_0 = arith.constant 0 : index
    %0 = vector.load %arg1[%c0, %c0_0] : memref<8x32xf32, #tpu.memory_space<vmem>>, vector<8x32xf32>
    %c0_1 = arith.constant 0 : index
    %c0_2 = arith.constant 0 : index
    %1 = vector.load %arg2[%c0_1, %c0_2] : memref<8x32xf32, #tpu.memory_space<vmem>>, vector<8x32xf32>
    %2 = arith.mulf %0, %0 : vector<8x32xf32>
    %cst = arith.constant dense<0.000000e+00> : vector<8xf32>
    %3 = vector.multi_reduction <add>, %2, %cst [1] : vector<8x32xf32> to vector<8xf32>
    %4 = vector.shape_cast %3 : vector<8xf32> to vector<8x1xf32>
    %5 = math.sqrt %4 : vector<8x1xf32>
    %cst_3 = arith.constant 9.99999993E-9 : f32
    %6 = vector.broadcast %cst_3 : f32 to vector<8x1xf32>
    %7 = arith.addf %5, %6 : vector<8x1xf32>
    %8 = tpu.reciprocal %7 : vector<8x1xf32> -> vector<8x1xf32>
    %9 = vector.broadcast %8 : vector<8x1xf32> to vector<8x32xf32>
    %10 = arith.mulf %0, %9 : vector<8x32xf32>
    %11 = arith.mulf %1, %1 : vector<8x32xf32>
    %cst_4 = arith.constant dense<0.000000e+00> : vector<8xf32>
    %12 = vector.multi_reduction <add>, %11, %cst_4 [1] : vector<8x32xf32> to vector<8xf32>
    %13 = vector.shape_cast %12 : vector<8xf32> to vector<8x1xf32>
    %14 = math.sqrt %13 : vector<8x1xf32>
    %cst_5 = arith.constant 9.99999993E-9 : f32
    %15 = vector.broadcast %cst_5 : f32 to vector<8x1xf32>
    %16 = arith.addf %14, %15 : vector<8x1xf32>
    %17 = tpu.reciprocal %16 : vector<8x1xf32> -> vector<8x1xf32>
    %18 = vector.broadcast %17 : vector<8x1xf32> to vector<8x32xf32>
    %19 = arith.mulf %1, %18 : vector<8x32xf32>
    %20 = tpu.concatenate %10, %19 in 0 : vector<8x32xf32>, vector<8x32xf32> -> vector<16x32xf32>
    %21 = tpu.concatenate %10, %19 in 0 : vector<8x32xf32>, vector<8x32xf32> -> vector<16x32xf32>
    %cst_6 = arith.constant dense<0.000000e+00> : vector<16x16xf32>
    %22 = tpu.matmul %20, %21, %cst_6 {dimension_numbers = #tpu.dot_dimension_numbers<[1], [1], [0], [0], [0, 0, 1, 0], [], []>} : vector<16x32xf32>, vector<16x32xf32>, vector<16x16xf32> -> vector<16x16xf32>
    %23 = vector.extract_strided_slice %22 {offsets = [0, 0], sizes = [8, 8], strides = [1, 1]} : vector<16x16xf32> to vector<8x8xf32>
    %24 = math.exp %23 : vector<8x8xf32>
    %cst_7 = arith.constant dense<0.000000e+00> : vector<8xf32>
    %25 = vector.multi_reduction <add>, %24, %cst_7 [1] : vector<8x8xf32> to vector<8xf32>
    %26 = vector.shape_cast %25 : vector<8xf32> to vector<8x1xf32>
    %27 = vector.extract_strided_slice %22 {offsets = [0, 8], sizes = [16, 8], strides = [1, 1]} : vector<16x16xf32> to vector<16x8xf32>
    %28 = math.exp %27 : vector<16x8xf32>
    %cst_8 = arith.constant dense<0.000000e+00> : vector<16xf32>
    %29 = vector.multi_reduction <add>, %28, %cst_8 [1] : vector<16x8xf32> to vector<16xf32>
    %30 = vector.shape_cast %29 : vector<16xf32> to vector<16x1xf32>
    %31 = math.log %26 : vector<8x1xf32>
    %32 = vector.shape_cast %31 : vector<8x1xf32> to vector<1x8x1xf32>
    %cst_9 = arith.constant dense<0.000000e+00> : vector<1xf32>
    %33 = vector.multi_reduction <add>, %32, %cst_9 [1, 2] : vector<1x8x1xf32> to vector<1xf32>
    %34 = vector.shape_cast %33 : vector<1xf32> to vector<1x1x1xf32>
    %35 = vector.extract %34[0, 0, 0] : f32 from vector<1x1x1xf32>
    %36 = math.log %30 : vector<16x1xf32>
    %37 = vector.shape_cast %36 : vector<16x1xf32> to vector<1x16x1xf32>
    %cst_10 = arith.constant dense<0.000000e+00> : vector<1xf32>
    %38 = vector.multi_reduction <add>, %37, %cst_10 [1, 2] : vector<1x16x1xf32> to vector<1xf32>
    %39 = vector.shape_cast %38 : vector<1xf32> to vector<1x1x1xf32>
    %40 = vector.extract %39[0, 0, 0] : f32 from vector<1x1x1xf32>
    %41 = arith.addf %35, %40 : f32
    %42 = arith.addf %10, %19 : vector<8x32xf32>
    %43 = arith.mulf %10, %42 : vector<8x32xf32>
    %44 = arith.mulf %19, %19 : vector<8x32xf32>
    %45 = arith.addf %43, %44 : vector<8x32xf32>
    %46 = vector.shape_cast %45 : vector<8x32xf32> to vector<1x8x32xf32>
    %cst_11 = arith.constant dense<0.000000e+00> : vector<1xf32>
    %47 = vector.multi_reduction <add>, %46, %cst_11 [1, 2] : vector<1x8x32xf32> to vector<1xf32>
    %48 = vector.shape_cast %47 : vector<1xf32> to vector<1x1x1xf32>
    %49 = vector.extract %48[0, 0, 0] : f32 from vector<1x1x1xf32>
    %50 = arith.subf %41, %49 : f32
    %c0_12 = arith.constant 0 : index
    %c0_13 = arith.constant 0 : index
    %51 = memref.load %arg3[%c0_12, %c0_13] : memref<1x1xf32, #tpu.memory_space<smem>>
    memref.store %50, %arg3[%c0_12, %c0_13] : memref<1x1xf32, #tpu.memory_space<smem>>
    return
  }
  func.func @transform_0(%arg0: i32) -> (i32, i32) {
    %c0_i32 = arith.constant 0 : i32
    %c0_i32_0 = arith.constant 0 : i32
    %c0_i32_1 = arith.constant 0 : i32
    return %c0_i32, %c0_i32_0 : i32, i32
  }
  func.func @transform_1(%arg0: i32) -> (i32, i32) {
    %c0_i32 = arith.constant 0 : i32
    %c0_i32_0 = arith.constant 0 : i32
    %c0_i32_1 = arith.constant 0 : i32
    return %c0_i32, %c0_i32_0 : i32, i32
  }
  func.func @transform_2(%arg0: i32) -> (i32, i32) {
    %c0_i32 = arith.constant 0 : i32
    %c0_i32_0 = arith.constant 0 : i32
    return %arg0, %c0_i32 : i32, i32
  }
}

</mosaic_0001>

<bundles_post_ra>
// kernel: tpu_custom_call.1
= control target key start
LH: loop header
LB: loop body
LE: loop exit
PB: predicated region body
PF: predicated region fallthrough
CT: control target
= control target key end

     0   :  { %7 = vsyncpa [#allocation3], 0  ;;  %s403_s0 = inlined_call_operand.hbm [shape: f32[8,32], index: 0, kind: input, shape index: {}]   ;;  %s404_s1 = inlined_call_operand.hbm [shape: f32[8,32], index: 1, kind: input, shape index: {}]   ;;  %s405_s2 = inlined_call_operand.hbm [shape: f32[1,1], index: 2, kind: output, shape index: {}]  }
   0x1   :  { %8 = vsyncpa [#allocation6], 0 }
   0x2   :  { %9 = vsyncpa [#allocation4], 0  ;;  %s341_s9 = smov [#allocation2]   ;;  %s342_s11 = smov [#allocation5]  }
   0x3   :  { %s16_s10 = sshll.u32 %s341_s9, 4  ;;  %s26_s12 = sshll.u32 %s342_s11, 4  ;;  %s17_s10 = int_to_ptr.vmem [resolvable:$true] %s16_s10  ;;  %s27_s12 = int_to_ptr.vmem [resolvable:$true] %s26_s12 }
   0x4   :  { %s281_s15 = scalar_lea.hbm %s403_s0, 128 }
   0x5   :  { %p282_p0 = scmp.ne.s32.totalorder %s403_s0, %s281_s15  ;;  %p285_p1 = scmp.lt.u32.totalorder %s281_s15, %s403_s0 }
   0x7   :  { %p287_p2 = pnand %p285_p1, %p282_p0 }
   0x9   :  { %290 = shalt.err (!%p287_p2)
}
   0xa   :  { %s291_s20 = scalar_lea.vmem %s17_s10, 128  ;;  %p296_p4 = scmp.lt.s32.totalorder %s17_s10, %s17_s10 }
   0xb   :  { %p292_p3 = scmp.ne.s32.totalorder %s17_s10, %s291_s20  ;;  %p297_p5 = scmp.lt.s32.totalorder %s291_s20, %s291_s20 }
   0xd   :  { %p298_p6 = por %p297_p5, %p296_p4 }
   0xf   :  { %p299_p7 = pnand %p298_p6, %p292_p3 }
  0x11   :  { %302 = shalt.err (!%p299_p7)
}
  0x12   :  { %19 = dma.hbm_to_vmem [thread:$0]  %s403_s0, 128, %s17_s10, [#allocation3]  }
  0x13   :  { %s303_s25 = scalar_lea.hbm %s404_s1, 128 }
  0x14   :  { %p304_p8 = scmp.ne.s32.totalorder %s404_s1, %s303_s25  ;;  %p307_p9 = scmp.lt.u32.totalorder %s303_s25, %s404_s1 }
  0x16   :  { %p309_p10 = pnand %p307_p9, %p304_p8 }
  0x18   :  { %312 = shalt.err (!%p309_p10)
}
  0x19   :  { %s313_s30 = scalar_lea.vmem %s27_s12, 128  ;;  %p318_p12 = scmp.lt.s32.totalorder %s27_s12, %s27_s12 }
  0x1a   :  { %p314_p11 = scmp.ne.s32.totalorder %s27_s12, %s313_s30  ;;  %p319_p13 = scmp.lt.s32.totalorder %s313_s30, %s313_s30 }
  0x1c   :  { %p320_p0 = por %p319_p13, %p318_p12 }
  0x1e   :  { %p321_p1 = pnand %p320_p0, %p314_p11 }
  0x20   :  { %324 = shalt.err (!%p321_p1)
}
  0x21   :  { %29 = dma.hbm_to_vmem [thread:$0]  %s404_s1, 128, %s27_s12, [#allocation6]  }
  0x22   :  { %335 = dma.done.wait [#allocation3], 128  }
  0x23   :  { %336 = vsyncadd [#allocation3], 4294967168 }
  0x24   :  { %337 = dma.done.wait [#allocation6], 128  }
  0x25   :  { %338 = vsyncadd [#allocation6], 4294967168  ;;  %v36_v0 = vld [vmem:[#allocation2] sm:$0xff]  ;;  %vm39_vm0 = vcmask 261120   ;;  %v37_v1 = vld [vmem:[#allocation5] sm:$0xff]  ;;  %s343_s1 = smov 120  }
  0x26   :  { %v38_v2 = vmul.f32 %v36_v0, %v36_v0  ;;  %v53_v3 = vmul.f32 %v37_v1, %v37_v1  ;;  %vm248_vm5 = vmpackc.low %vm39_vm0, %vm39_vm0  ;;  %vm150_vm6 = vcmask 64512   ;;  %vm172_vm7 = vcmask 7168   ;;  %s325_s11 = scalar_lea.hbm %s405_s2, 16 }
  0x27   :  { %p326_p2 = scmp.ne.s32.totalorder %s405_s2, %s325_s11  ;;  %p329_p3 = scmp.lt.u32.totalorder %s325_s11, %s405_s2 }
  0x28   :  { %v40_v4 = vsel %vm39_vm0, %v38_v2, 0.0  ;;  %v54_v5 = vsel %vm39_vm0, %v53_v3, 0.0 }
  0x29   :  { %41 = vadd.xlane.f32.xlu0 %v40_v4  ;;  %p331_p4 = pnand %p329_p3, %p326_p2 }
  0x2d   :  { %55 = vadd.xlane.f32.xlu0 %v54_v5 }
  0xb6   :  { %v42_v6 = vpop.xlane.xlu0 %41 }
  0xb7   :  { %263 = vrsqrt.f32 %v42_v6  ;;  %vm45_vm1 = vcmp.eq.f32.partialorder %v42_v6, inf  ;;  %v48_v10 = vand.u32 2147483648, %v42_v6  ;;  %vm47_vm2 = vcmp.eq.f32.partialorder %v42_v6, 0.0 }
  0xba   :  { %v56_v7 = vpop.xlane.xlu0 %55 }
  0xbb   :  { %265 = vrsqrt.f32 %v56_v7  ;;  %vm59_vm3 = vcmp.eq.f32.partialorder %v56_v7, inf  ;;  %v62_v16 = vand.u32 2147483648, %v56_v7  ;;  %vm61_vm4 = vcmp.eq.f32.partialorder %v56_v7, 0.0 }
  0xc1   :  { %v264_v8 = vpop.eup %263 }
  0xc2   :  { %v44_v9 = vmul.f32 %v264_v8, %v42_v6 }
  0xc4   :  { %v46_v11 = vsel %vm45_vm1, %v42_v6, %v44_v9 }
  0xc5   :  { %v266_v12 = vpop.eup %265  ;;  %v49_v13 = vsel %vm47_vm2, %v48_v10, %v46_v11 }
  0xc6   :  { %v50_v14 = vadd.f32 1e-08, %v49_v13  ;;  %v58_v15 = vmul.f32 %v266_v12, %v56_v7 }
  0xc8   :  { %267 = vrcp.f32 %v50_v14  ;;  %v60_v17 = vsel %vm59_vm3, %v56_v7, %v58_v15 }
  0xc9   :  { %v63_v18 = vsel %vm61_vm4, %v62_v16, %v60_v17 }
  0xca   :  { %v64_v19 = vadd.f32 1e-08, %v63_v18 }
  0xcc   :  { %269 = vrcp.f32 %v64_v19 }
  0xd2   :  { %v268_v20 = vpop.eup %267 }
  0xd3   :  { %v52_v21 = vmul.f32 %v268_v20, %v36_v0 }
  0xd5   :  { %244 = vmatprep.mubr.msk.f32.mxu0 %vm39_vm0, %v52_v21 }
  0xd6   :  { %v270_v22 = vpop.eup %269 }
  0xd7   :  { %v66_v23 = vmul.f32 %v270_v22, %v37_v1 }
  0xd9   :  { %v247_v24 = vpack.c.bf16 %v66_v23, %v52_v21  ;;  %v200_v25 = vadd.f32 %v66_v23, %v52_v21  ;;  %v202_v27 = vmul.f32 %v66_v23, %v66_v23 }
  0xdb   :  { %249 = vmatprep.subr.msk.bf16.mxu0 %vm248_vm5, %v247_v24  ;;  %v201_v26 = vmul.f32 %v200_v25, %v52_v21 }
  0xdc   :  { %252 = vmatpush3.bf16.xpose.msk.msra.mxu0 %vm248_vm5, %v247_v24 }
  0xdd   :  { %v203_v28 = vadd.f32 %v202_v27, %v201_v26 }
  0xdf   :  { %v204_v53 = vsel %vm39_vm0, %v203_v28, 0.0 }
  0xe3   :  { %245 = vmatmul.mubr.msk.f32.vlgmr.msra.gmra.mrb[0].mxu0 %vm39_vm0, %v66_v23 }
 0x1b6   :  { %v246_v29 = vpop.f32.mrb[0].mxu0 }
 0x1b7   :  { %v139_v30 = vpop.f32.mrb[1].mxu0  ;;  %v154_v32 = vmul.f32 1.442695, %v246_v29 }
 0x1b8   :  { %v148_v31 = vmul.f32 1.442695, %v139_v30 }
 0x1ba   :  { %271 = vpow2.f32 %v148_v31 }
 0x1bb   :  { %273 = vpow2.f32 %v154_v32 }
 0x1c4   :  { %v272_v33 = vpop.eup %271 }
 0x1c5   :  { %158 = vrot.lane.b32.xlu1 %v272_v33, %s343_s1  ;;  %v274_v34 = vpop.eup %273  ;;  %v151_v39 = vsel %vm150_vm6, %v272_v33, 0.0 }
 0x1c9   :  { %160 = vrot.lane.b32.xlu1 %v274_v34, %s343_s1 }
 0x237   :  { %v159_v35 = vpop.permute.xlu1 %158 }
 0x238   :  { %v164_v36 = vsel %vm150_vm6, %v159_v35, 0.0 }
 0x239   :  { %165 = vadd.xlane.f32.xlu0 %v164_v36 }
 0x23b   :  { %v161_v37 = vpop.permute.xlu1 %160 }
 0x23c   :  { %v167_v38 = vsel %vm150_vm6, %v161_v37, 0.0 }
 0x23d   :  { %168 = vadd.xlane.f32.xlu1 %v167_v38  ;;  %152 = vadd.xlane.f32.xlu0 %v151_v39 }
 0x2c6   :  { %v166_v40 = vpop.xlane.xlu0 %165 }
 0x2c7   :  { %275 = vlog2.f32 %v166_v40 }
 0x2ca   :  { %v169_v41 = vpop.xlane.xlu1 %168  ;;  %v153_v42 = vpop.xlane.xlu0 %152 }
 0x2cb   :  { %277 = vlog2.f32 %v169_v41 }
 0x2cc   :  { %279 = vlog2.f32 %v153_v42 }
 0x2d1   :  { %v276_v43 = vpop.eup %275 }
 0x2d2   :  { %v184_v47 = vmul.f32 0.6931472, %v276_v43 }
 0x2d4   :  { %v187_v51 = vsel %vm172_vm7, %v184_v47, 0.0 }
 0x2d5   :  { %v278_v44 = vpop.eup %277 }
 0x2d6   :  { %v280_v45 = vpop.eup %279  ;;  %v186_v46 = vmul.f32 0.6931472, %v278_v44 }
 0x2d7   :  { %v171_v48 = vmul.f32 0.6931472, %v280_v45 }
 0x2d8   :  { %v188_v50 = vsel %vm172_vm7, %v186_v46, 0.0 }
 0x2d9   :  { %v173_v49 = vsel %vm172_vm7, %v171_v48, 0.0  ;;  %v189_v52 = vadd.f32 %v188_v50, %v187_v51 }
 0x2da   :  { %174 = vadd.xlane.f32.xlu0 %v173_v49 }
 0x2de   :  { %190 = vadd.xlane.f32.xlu0 %v189_v52 }
 0x2e2   :  { %205 = vadd.xlane.f32.xlu0 %v204_v53 }
 0x367   :  { %v175_v54 = vpop.xlane.xlu0 %174 }
 0x368   :  { %v176_v55 = vrot.slane %v175_v54, 4 }
 0x36a   :  { %v177_v56 = vadd.f32 %v176_v55, %v175_v54 }
 0x36b   :  { %v191_v57 = vpop.xlane.xlu0 %190 }
 0x36c   :  { %v178_v58 = vrot.slane %v177_v56, 2  ;;  %v192_v59 = vrot.slane %v191_v57, 4 }
 0x36e   :  { %v193_v60 = vadd.f32 %v192_v59, %v191_v57  ;;  %v179_v61 = vadd.f32 %v178_v58, %v177_v56 }
 0x36f   :  { %v206_v62 = vpop.xlane.xlu0 %205 }
 0x370   :  { %v194_v63 = vrot.slane %v193_v60, 2  ;;  %v207_v0 = vrot.slane %v206_v62, 4  ;;  %v180_v1 = vrot.slane %v179_v61, 1 }
 0x372   :  { %v208_v2 = vadd.f32 %v207_v0, %v206_v62  ;;  %v181_v3 = vadd.f32 %v180_v1, %v179_v61  ;;  %v195_v4 = vadd.f32 %v194_v63, %v193_v60 }
 0x374   :  { %v209_v5 = vrot.slane %v208_v2, 2  ;;  %253 = vpush %v181_v3  ;;  %v196_v6 = vrot.slane %v195_v4, 1 }
 0x376   :  { %v210_v7 = vadd.f32 %v209_v5, %v208_v2  ;;  %v197_v8 = vadd.f32 %v196_v6, %v195_v4 }
 0x378   :  { %255 = vpush %v197_v8  ;;  %v211_v9 = vrot.slane %v210_v7, 1 }
 0x37a   :  { %v212_v10 = vadd.f32 %v211_v9, %v210_v7 }
 0x37c   :  { %257 = vpush %v212_v10 }
 0x3a5   :  { %s254_s4 = spop %253 }
 0x3a9   :  { %s256_s5 = spop %255 }
 0x3aa   :  { %s199_s6 = sadd.f32 %s256_s5, %s254_s4 }
 0x3ad   :  { %s258_s7 = spop %257 }
 0x3ae   :  { %s214_s8 = ssub.f32 %s199_s6, %s258_s7 }
 0x3b0   :  { %216 = sst [smem:[#allocation7]] %s214_s8 }
 0x3b1   :  { %334 = shalt.err (!%p331_p4)
}
 0x3b2   :  { %s344_s16 = smov [#allocation7]  }
 0x3b3   :  { %224 = dma.smem_to_hbm %s344_s16, 16, %s405_s2, [#allocation4]  }
 0x3b4   :  { %339 = dma.done.wait [#allocation4], 16  }
 0x3b5   :  { %340 = vsyncadd [#allocation4], 4294967280 }
 0x3b6   :  { %228 = sfence }
 0x3b7   :  { %229 = vsyncpa [#allocation3], 1 }
 0x3b8   :  { %230 = vsyncpa [#allocation6], 1 }
 0x3b9   :  { %231 = vsyncpa [#allocation4], 1 }

</bundles_post_ra>
